<compile_context>
chip_gen: v7x
topology: tpu7x:2x2x1
jax: 0.10.0
libtpu: 0.0.40
codegen_flags: <defaults>
</compile_context>

<pallas_src>
import jax
import jax.numpy as jnp
from jax.experimental import pallas as pl
from jax.experimental.pallas import tpu as pltpu

_LANE = 128
_MAX_BLOCK_ROWS = 4096  # 4096 * 128 * 4 B = 2 MiB per f32 block


def _copy_kernel(x_ref, o_ref):
    # Identity: stream the current (block_rows, 128) tile through VMEM.
    o_ref[...] = x_ref[...]


def noop_layer(x):
    """Identity forward pass of NoopLayer via a lane-dense Pallas copy kernel.

    x: array of any shape / dtype (NCHW in the original module).
    Returns an array identical to x (same shape, dtype, values).
    """
    orig_shape = x.shape
    total = x.size

    # Flatten to a lane-dense 2-D slab: (rows, 128).
    rows = -(-total // _LANE)                                # ceil
    rows_8 = ((rows + 7) // 8) * 8                           # sublane multiple
    block_rows = min(_MAX_BLOCK_ROWS, rows_8)
    padded_rows = ((rows + block_rows - 1) // block_rows) * block_rows
    padded_total = padded_rows * _LANE

    flat = x.reshape(-1)
    if padded_total != total:
        flat = jnp.pad(flat, (0, padded_total - total))
    x2 = flat.reshape(padded_rows, _LANE)

    grid = (padded_rows // block_rows,)

    y2 = pl.pallas_call(
        _copy_kernel,
        out_shape=jax.ShapeDtypeStruct((padded_rows, _LANE), x.dtype),
        grid_spec=pltpu.PrefetchScalarGridSpec(
            num_scalar_prefetch=0,
            grid=grid,
            in_specs=[pl.BlockSpec((block_rows, _LANE), lambda i: (i, 0))],
            out_specs=pl.BlockSpec((block_rows, _LANE), lambda i: (i, 0)),
        ),
        # Let XLA alias output onto the input buffer (no second HBM alloc).
        input_output_aliases={0: 0},
        compiler_params=pltpu.CompilerParams(
            dimension_semantics=("parallel",),
        ),
    )(x2)

    y_flat = y2.reshape(-1)
    if padded_total != total:
        y_flat = y_flat[:total]
    return y_flat.reshape(orig_shape)


if __name__ == "__main__":
    key = jax.random.PRNGKey(0)
    x = jax.random.normal(key, (2, 4, 16, 16), dtype=jnp.float32)

    y = jax.jit(noop_layer)(x)
    jax.block_until_ready(y)

    assert y.shape == x.shape and y.dtype == x.dtype
    assert bool(jnp.array_equal(y, x))
    print("KERNEL_OK")
</pallas_src>

<mosaic_0001>
module attributes {stable_mosaic.version = 11 : i64} {
  func.func @_copy_kernel(%arg0: i32, %arg1: memref<16x128xf32, #tpu.memory_space<vmem>>, %arg2: memref<16x128xf32, #tpu.memory_space<vmem>>) attributes {dimension_semantics = [#tpu.dimension_semantics<parallel>], iteration_bounds = array<i64: 1>, scalar_prefetch = 0 : i64, scratch_operands = 0 : i64, tpu.core_type = #tpu.core_type<tc>, window_params = [{transform_indices = @transform_0, window_bounds = array<i64: 16, 128>}, {transform_indices = @transform_1, window_bounds = array<i64: 16, 128>}]} {
    %c0 = arith.constant 0 : index
    %c0_0 = arith.constant 0 : index
    %0 = vector.load %arg1[%c0, %c0_0] : memref<16x128xf32, #tpu.memory_space<vmem>>, vector<16x128xf32>
    %c0_1 = arith.constant 0 : index
    %c0_2 = arith.constant 0 : index
    %1 = vector.load %arg2[%c0_1, %c0_2] : memref<16x128xf32, #tpu.memory_space<vmem>>, vector<16x128xf32>
    tpu.vector_store %arg2[%c0_1, %c0_2], %0 {strides = array<i32>} : memref<16x128xf32, #tpu.memory_space<vmem>>, vector<16x128xf32>,
    return
  }
  func.func @transform_0(%arg0: i32) -> (i32, i32) {
    %c0_i32 = arith.constant 0 : i32
    %c0_i32_0 = arith.constant 0 : i32
    return %arg0, %c0_i32 : i32, i32
  }
  func.func @transform_1(%arg0: i32) -> (i32, i32) {
    %c0_i32 = arith.constant 0 : i32
    %c0_i32_0 = arith.constant 0 : i32
    return %arg0, %c0_i32 : i32, i32
  }
}

</mosaic_0001>

<bundles_post_ra>
// kernel: noop_layer.1
= control target key start
LH: loop header
LB: loop body
LE: loop exit
PB: predicated region body
PF: predicated region fallthrough
CT: control target
= control target key end

     0   :  { %s38_s0 = inlined_call_operand.vmem [shape: f32[16,128], index: 0, kind: input, shape index: {}, may-alias: {0,1}]   ;;  %s39_s1 = inlined_call_operand.vmem [shape: f32[16,128], index: 1, kind: output, shape index: {}, may-alias: {0,1}]  }
   0x1   :  { %v8_v0 = vld [vmem:[%s38_s0] sm:$0xff]  ;;  %v9_v1 = vld [vmem:[%s38_s0 + $0x8] sm:$0xff] }
   0x2   :  { %10 = vst [vmem:[%s39_s1] sm:$0xff] %v8_v0  ;;  %11 = vst [vmem:[%s39_s1 + $0x8] sm:$0xff] %v9_v1 }

</bundles_post_ra>
